<compile_context>
chip_gen: v6e
topology: v6e:2x2x1
jax: 0.10.0
libtpu: 0.0.40
codegen_flags: <defaults>
</compile_context>

<pallas_src>
import functools

import jax
import jax.numpy as jnp
from jax.experimental import pallas as pl
from jax.experimental.pallas import tpu as pltpu

NEG_INF_FILL = -10000000000.0


def _round_up(x, m):
    return ((x + m - 1) // m) * m


@functools.lru_cache(maxsize=None)
def _vmem_capacity_bytes():
    """Physical VMEM per TensorCore (v5e/v6e: 128 MiB, v7x: 64 MiB)."""
    try:
        info = pltpu.get_tpu_info()
        cap = int(getattr(info, "vmem_capacity_bytes", 0) or 0)
        if cap > 0:
            return cap
    except Exception:
        pass
    return 64 * 1024 * 1024  # conservative default (v7x per-TC)


@functools.lru_cache(maxsize=None)
def _fold_reshape_supported():
    """Probe whether Mosaic lowers the minor-dim merge reshape used to unfold the
    packed score columns back into a lane-major (BB, L) layout.  If not, the
    wrapper falls back to the unfolded (proven) kernel structure."""
    def probe(bb, r, fold):
        def k(x_ref, o_ref):
            o_ref[...] = x_ref[...][:, :, :fold].reshape(bb, r * fold)

        x = jnp.arange(bb * r * 2 * fold, dtype=jnp.float32).reshape(bb, r, 2 * fold)
        out = pl.pallas_call(
            k, out_shape=jax.ShapeDtypeStruct((bb, r * fold), jnp.float32))(x)
        jax.block_until_ready(out)
        return bool(jnp.allclose(out, x[:, :, :fold].reshape(bb, r * fold)))

    try:
        return probe(2, 4, 4) and probe(8, 64, 2)
    except Exception:
        return False


def _out_kernel(m1_ref, m2_ref, m3_ref, cmask_ref, w_ref, p1_ref, p2_ref, *, fold):
    BB, R, Dp = m1_ref.shape
    L = R * fold

    # Flatten (BB, R, Dp) -> (BB*R, Dp); Dp stays on lanes (leading-dim merge only).
    m1 = m1_ref[...].reshape(BB * R, Dp)
    m2 = m2_ref[...].reshape(BB * R, Dp)
    m3 = m3_ref[...].reshape(BB * R, Dp)
    w = w_ref[...]

    # One MXU contraction per input against the packed (block-diagonal) weights.
    # Columns [0, fold) hold start scores, [fold, 2*fold) hold end scores for the
    # `fold` consecutive sequence positions packed into each lane row.
    s = (jnp.dot(m1, w[0], preferred_element_type=jnp.float32)
         + jnp.dot(m2, w[1], preferred_element_type=jnp.float32)
         + jnp.dot(m3, w[2], preferred_element_type=jnp.float32))    # (BB*R, 2*fold)
    s3 = s.reshape(BB, R, 2 * fold)                                  # leading split

    if fold == 1:
        s_start = s3[:, :, 0]                                        # (BB, L)
        s_end = s3[:, :, 1]
    else:
        s_start = s3[:, :, :fold].reshape(BB, L)                     # unfold to lane-major
        s_end = s3[:, :, fold:].reshape(BB, L)

    masked = cmask_ref[...] != 0                                     # (BB, L)

    def masked_log_softmax(x):                                       # x: (BB, L)
        x = jnp.where(masked, NEG_INF_FILL, x)
        m = jnp.max(x, axis=-1, keepdims=True)
        xs = x - m
        lse = jnp.log(jnp.sum(jnp.exp(xs), axis=-1, keepdims=True))
        return xs - lse

    p1_ref[...] = masked_log_softmax(s_start)
    p2_ref[...] = masked_log_softmax(s_end)


@functools.partial(jax.jit, static_argnames=("fold", "block_b"))
def _out_forward_impl(M1, M2, M3, Cmask, w_start, w_end, *, fold, block_b):
    B, L, D = M1.shape
    in_dtype = M1.dtype
    itemsize = jnp.dtype(in_dtype).itemsize

    R = L // fold           # packed rows per batch element
    Dp = D * fold           # packed feature (lane) dim, = 128 when folded
    C = 2 * fold            # score columns: [0,fold)=start, [fold,2*fold)=end

    if fold > 1:            # free row-major reshape, no HBM data movement
        M1 = M1.reshape(B, R, Dp)
        M2 = M2.reshape(B, R, Dp)
        M3 = M3.reshape(B, R, Dp)

    cmask_i = (Cmask != 0).astype(jnp.int32)

    # ---- packed block-diagonal weights: (3, Dp, 2*fold) ----------------------
    w_dtype = in_dtype if jnp.dtype(in_dtype) == jnp.bfloat16 else jnp.float32
    ws = jnp.reshape(w_start, (-1,)).astype(jnp.float32)
    we = jnp.reshape(w_end, (-1,)).astype(jnp.float32)
    eye_f = jnp.eye(fold, dtype=jnp.float32)
    blk = lambda v: jnp.kron(eye_f, v.reshape(D, 1))                 # (Dp, fold)
    zcol = jnp.zeros((Dp, fold), jnp.float32)
    W0 = jnp.concatenate([blk(ws[:D]), blk(we[:D])], axis=1)         # M1 -> start | end
    W1 = jnp.concatenate([blk(ws[D:]), zcol], axis=1)                # M2 -> start
    W2 = jnp.concatenate([zcol, blk(we[D:])], axis=1)                # M3 -> end
    Wpack = jnp.stack([W0, W1, W2]).astype(w_dtype)

    # ---- batch block size from a per-generation VMEM budget (padded tiles) ---
    vmem_cap = _vmem_capacity_bytes()
    budget = int(vmem_cap * 0.6)
    subl = 16 if itemsize == 2 else 8
    Rp = _round_up(R, subl)
    Dpp = _round_up(Dp, 128)
    Lp = _round_up(L, 128)
    per_b = (3 * 2 * Rp * Dpp * itemsize     # M1/M2/M3 tiles, double-buffered
             + 2 * Lp * 4                    # int32 mask tile, double-buffered
             + 2 * 2 * Lp * 4                # two f32 output tiles, double-buffered
             + 3 * R * 128 * 4               # lane-padded f32 score intermediates
             + 6 * Lp * 4)                   # softmax temporaries
    fixed = 2 * 3 * _round_up(Dp, subl) * 128 * 4     # resident packed weights
    cap = max(1, (budget - fixed) // per_b)

    if block_b is not None:
        BB = int(block_b)
    elif B <= 8 or (cap >= B and B <= 16):
        BB = B
    elif cap >= B:
        BB = _round_up((B + 1) // 2, 8)      # >=2 grid steps: feeds v7x's 2nd TC
    else:
        BB = max(8, (min(cap, B) // 8) * 8)
    # TODO(synk): for very long rows (huge L*D) where even BB=8 exceeds the budget,
    # add an inner L-tiling loop with an online log-softmax instead of whole rows.

    grid = (pl.cdiv(B, BB),)                 # partial last block, no jnp.pad copies

    m_spec = pl.BlockSpec((BB, R, Dp), lambda b: (b, 0, 0))
    c_spec = pl.BlockSpec((BB, L), lambda b: (b, 0))
    w_spec = pl.BlockSpec((3, Dp, C), lambda b: (0, 0, 0))
    o_spec = pl.BlockSpec((BB, L), lambda b: (b, 0))

    kernel = functools.partial(_out_kernel, fold=fold)
    p1, p2 = pl.pallas_call(
        kernel,
        out_shape=(jax.ShapeDtypeStruct((B, L), jnp.float32),
                   jax.ShapeDtypeStruct((B, L), jnp.float32)),
        grid_spec=pltpu.PrefetchScalarGridSpec(
            num_scalar_prefetch=0,
            grid=grid,
            in_specs=[m_spec, m_spec, m_spec, c_spec, w_spec],
            out_specs=[o_spec, o_spec],
        ),
        compiler_params=pltpu.CompilerParams(
            dimension_semantics=("parallel",),
            vmem_limit_bytes=max(32 * 1024 * 1024, int(vmem_cap * 0.85)),
        ),
    )(M1, M2, M3, cmask_i, Wpack)
    return p1, p2


def out_forward(M1, M2, M3, Cmask, w_start, w_end, *, block_b=None):
    """Pallas forward for the `Out` module.

    M1, M2, M3 : (B, L, D) float
    Cmask      : (B, L)    (nonzero => masked position)
    w_start    : (2*D,)    start_lin weight (row of the (1, 2D) Linear weight)
    w_end      : (2*D,)    end_lin   weight
    returns    : (p1, p2), each (B, L) float32 log-probabilities over L
    """
    B, L, D = M1.shape
    if D < 128 and 128 % D == 0 and L % (128 // D) == 0 and _fold_reshape_supported():
        fold = 128 // D
    else:
        fold = 1
    return _out_forward_impl(M1, M2, M3, Cmask, w_start, w_end,
                             fold=fold, block_b=block_b)


def _reference(M1, M2, M3, Cmask, w_start, w_end):
    """Pure-JAX reference matching the PyTorch forward."""
    s1 = jnp.concatenate([M1, M2], axis=2).astype(jnp.float32) @ w_start.astype(jnp.float32)
    s1 = jnp.where(Cmask != 0, NEG_INF_FILL, s1)
    p1 = jax.nn.log_softmax(s1, axis=1)
    s2 = jnp.concatenate([M1, M3], axis=2).astype(jnp.float32) @ w_end.astype(jnp.float32)
    s2 = jnp.where(Cmask != 0, NEG_INF_FILL, s2)
    p2 = jax.nn.log_softmax(s2, axis=1)
    return p1, p2


if __name__ == "__main__":
    # ---- test 1: small shapes consistent with the module (model_dim = 32) ----
    B, L, D = 2, 16, 32

    key = jax.random.PRNGKey(0)
    k1, k2, k3, k4, k5, k6 = jax.random.split(key, 6)

    M1 = jax.random.normal(k1, (B, L, D), dtype=jnp.float32)
    M2 = jax.random.normal(k2, (B, L, D), dtype=jnp.float32)
    M3 = jax.random.normal(k3, (B, L, D), dtype=jnp.float32)

    lengths = jnp.array([L, L - 5], dtype=jnp.int32)
    Cmask = (jnp.arange(L)[None, :] >= lengths[:, None]).astype(jnp.float32)  # (B, L)

    w_start = jax.random.normal(k5, (2 * D,), dtype=jnp.float32) * 0.1
    w_end = jax.random.normal(k6, (2 * D,), dtype=jnp.float32) * 0.1

    p1, p2 = out_forward(M1, M2, M3, Cmask, w_start, w_end)
    jax.block_until_ready((p1, p2))

    r1, r2 = _reference(M1, M2, M3, Cmask, w_start, w_end)
    assert p1.shape == (B, L) and p2.shape == (B, L)
    assert jnp.allclose(p1, r1, atol=1e-4, rtol=1e-4)
    assert jnp.allclose(p2, r2, atol=1e-4, rtol=1e-4)

    # ---- test 2: non-divisible batch (B=20) -> partial last block, no padding ----
    B2, L2, D2 = 20, 128, 64
    kk = jax.random.split(jax.random.PRNGKey(1), 6)
    M1b = jax.random.normal(kk[0], (B2, L2, D2), dtype=jnp.float32)
    M2b = jax.random.normal(kk[1], (B2, L2, D2), dtype=jnp.float32)
    M3b = jax.random.normal(kk[2], (B2, L2, D2), dtype=jnp.float32)
    lengths2 = jax.random.randint(kk[3], (B2,), 1, L2 + 1)
    Cmask2 = (jnp.arange(L2)[None, :] >= lengths2[:, None]).astype(jnp.float32)
    w_start2 = jax.random.normal(kk[4], (2 * D2,), dtype=jnp.float32) * 0.1
    w_end2 = jax.random.normal(kk[5], (2 * D2,), dtype=jnp.float32) * 0.1

    q1, q2 = out_forward(M1b, M2b, M3b, Cmask2, w_start2, w_end2)
    jax.block_until_ready((q1, q2))
    r1b, r2b = _reference(M1b, M2b, M3b, Cmask2, w_start2, w_end2)
    assert q1.shape == (B2, L2) and q2.shape == (B2, L2)
    assert jnp.allclose(q1, r1b, atol=1e-4, rtol=1e-4)
    assert jnp.allclose(q2, r2b, atol=1e-4, rtol=1e-4)

    print("KERNEL_OK")
</pallas_src>

<mosaic_0001>
module attributes {stable_mosaic.version = 11 : i64} {
  func.func @k(%arg0: memref<2x4x8xf32, #tpu.memory_space<vmem>>, %arg1: memref<2x16xf32, #tpu.memory_space<vmem>>) attributes {dimension_semantics = [], scalar_prefetch = 0 : i64, scratch_operands = 0 : i64, tpu.core_type = #tpu.core_type<tc>} {
    %c0 = arith.constant 0 : index
    %c0_0 = arith.constant 0 : index
    %c0_1 = arith.constant 0 : index
    %0 = vector.load %arg0[%c0, %c0_0, %c0_1] : memref<2x4x8xf32, #tpu.memory_space<vmem>>, vector<2x4x8xf32>
    %1 = vector.extract_strided_slice %0 {offsets = [0, 0, 0], sizes = [2, 4, 4], strides = [1, 1, 1]} : vector<2x4x8xf32> to vector<2x4x4xf32>
    %2 = vector.shape_cast %1 : vector<2x4x4xf32> to vector<2x16xf32>
    %c0_2 = arith.constant 0 : index
    %c0_3 = arith.constant 0 : index
    %3 = vector.load %arg1[%c0_2, %c0_3] : memref<2x16xf32, #tpu.memory_space<vmem>>, vector<2x16xf32>
    tpu.vector_store %arg1[%c0_2, %c0_3], %2 {strides = array<i32>} : memref<2x16xf32, #tpu.memory_space<vmem>>, vector<2x16xf32>,
    return
  }
}

module attributes {stable_mosaic.version = 11 : i64} {
  func.func @_out_kernel(%arg0: i32, %arg1: memref<2x16x32xf32, #tpu.memory_space<vmem>>, %arg2: memref<2x16x32xf32, #tpu.memory_space<vmem>>, %arg3: memref<2x16x32xf32, #tpu.memory_space<vmem>>, %arg4: memref<2x16xi32, #tpu.memory_space<vmem>>, %arg5: memref<3x32x2xf32, #tpu.memory_space<vmem>>, %arg6: memref<2x16xf32, #tpu.memory_space<vmem>>, %arg7: memref<2x16xf32, #tpu.memory_space<vmem>>) attributes {dimension_semantics = [#tpu.dimension_semantics<parallel>], iteration_bounds = array<i64: 1>, scalar_prefetch = 0 : i64, scratch_operands = 0 : i64, tpu.core_type = #tpu.core_type<tc>, window_params = [{transform_indices = @transform_0, window_bounds = array<i64: 2, 16, 32>}, {transform_indices = @transform_1, window_bounds = array<i64: 2, 16, 32>}, {transform_indices = @transform_2, window_bounds = array<i64: 2, 16, 32>}, {transform_indices = @transform_3, window_bounds = array<i64: 2, 16>}, {pipeline_mode = #tpu.pipeline_mode<synchronous>, transform_indices = @transform_4, window_bounds = array<i64: 3, 32, 2>}, {transform_indices = @transform_5, window_bounds = array<i64: 2, 16>}, {transform_indices = @transform_6, window_bounds = array<i64: 2, 16>}]} {
    %c0 = arith.constant 0 : index
    %c0_0 = arith.constant 0 : index
    %c0_1 = arith.constant 0 : index
    %0 = vector.load %arg1[%c0, %c0_0, %c0_1] : memref<2x16x32xf32, #tpu.memory_space<vmem>>, vector<2x16x32xf32>
    %1 = vector.shape_cast %0 : vector<2x16x32xf32> to vector<32x32xf32>
    %c0_2 = arith.constant 0 : index
    %c0_3 = arith.constant 0 : index
    %c0_4 = arith.constant 0 : index
    %2 = vector.load %arg2[%c0_2, %c0_3, %c0_4] : memref<2x16x32xf32, #tpu.memory_space<vmem>>, vector<2x16x32xf32>
    %3 = vector.shape_cast %2 : vector<2x16x32xf32> to vector<32x32xf32>
    %c0_5 = arith.constant 0 : index
    %c0_6 = arith.constant 0 : index
    %c0_7 = arith.constant 0 : index
    %4 = vector.load %arg3[%c0_5, %c0_6, %c0_7] : memref<2x16x32xf32, #tpu.memory_space<vmem>>, vector<2x16x32xf32>
    %5 = vector.shape_cast %4 : vector<2x16x32xf32> to vector<32x32xf32>
    %c0_8 = arith.constant 0 : index
    %c0_9 = arith.constant 0 : index
    %c0_10 = arith.constant 0 : index
    %6 = vector.load %arg5[%c0_8, %c0_9, %c0_10] : memref<3x32x2xf32, #tpu.memory_space<vmem>>, vector<3x32x2xf32>
    %7 = vector.extract_strided_slice %6 {offsets = [0, 0, 0], sizes = [1, 32, 2], strides = [1, 1, 1]} : vector<3x32x2xf32> to vector<1x32x2xf32>
    %8 = vector.shape_cast %7 : vector<1x32x2xf32> to vector<32x2xf32>
    %cst = arith.constant dense<0.000000e+00> : vector<32x2xf32>
    %9 = tpu.matmul %1, %8, %cst {dimension_numbers = #tpu.dot_dimension_numbers<[1], [0], [0], [1], [0, 0, 1, 1], [], []>} : vector<32x32xf32>, vector<32x2xf32>, vector<32x2xf32> -> vector<32x2xf32>
    %10 = vector.extract_strided_slice %6 {offsets = [1, 0, 0], sizes = [1, 32, 2], strides = [1, 1, 1]} : vector<3x32x2xf32> to vector<1x32x2xf32>
    %11 = vector.shape_cast %10 : vector<1x32x2xf32> to vector<32x2xf32>
    %cst_11 = arith.constant dense<0.000000e+00> : vector<32x2xf32>
    %12 = tpu.matmul %3, %11, %cst_11 {dimension_numbers = #tpu.dot_dimension_numbers<[1], [0], [0], [1], [0, 0, 1, 1], [], []>} : vector<32x32xf32>, vector<32x2xf32>, vector<32x2xf32> -> vector<32x2xf32>
    %13 = arith.addf %9, %12 : vector<32x2xf32>
    %14 = vector.extract_strided_slice %6 {offsets = [2, 0, 0], sizes = [1, 32, 2], strides = [1, 1, 1]} : vector<3x32x2xf32> to vector<1x32x2xf32>
    %15 = vector.shape_cast %14 : vector<1x32x2xf32> to vector<32x2xf32>
    %cst_12 = arith.constant dense<0.000000e+00> : vector<32x2xf32>
    %16 = tpu.matmul %5, %15, %cst_12 {dimension_numbers = #tpu.dot_dimension_numbers<[1], [0], [0], [1], [0, 0, 1, 1], [], []>} : vector<32x32xf32>, vector<32x2xf32>, vector<32x2xf32> -> vector<32x2xf32>
    %17 = arith.addf %13, %16 : vector<32x2xf32>
    %18 = vector.shape_cast %17 : vector<32x2xf32> to vector<2x16x2xf32>
    %19 = vector.extract_strided_slice %18 {offsets = [0, 0, 0], sizes = [2, 16, 1], strides = [1, 1, 1]} : vector<2x16x2xf32> to vector<2x16x1xf32>
    %20 = vector.shape_cast %19 : vector<2x16x1xf32> to vector<2x16xf32>
    %21 = vector.extract_strided_slice %18 {offsets = [0, 0, 1], sizes = [2, 16, 1], strides = [1, 1, 1]} : vector<2x16x2xf32> to vector<2x16x1xf32>
    %22 = vector.shape_cast %21 : vector<2x16x1xf32> to vector<2x16xf32>
    %c0_13 = arith.constant 0 : index
    %c0_14 = arith.constant 0 : index
    %23 = vector.load %arg4[%c0_13, %c0_14] : memref<2x16xi32, #tpu.memory_space<vmem>>, vector<2x16xi32>
    %c0_i32 = arith.constant 0 : i32
    %24 = vector.broadcast %c0_i32 : i32 to vector<2x16xi32>
    %25 = arith.cmpi ne, %23, %24 : vector<2x16xi32>
    %cst_15 = arith.constant -1.000000e+10 : f32
    %26 = vector.broadcast %cst_15 : f32 to vector<2x16xf32>
    %27 = arith.select %25, %26, %20 : vector<2x16xi1>, vector<2x16xf32>
    %cst_16 = arith.constant dense<0xFF800000> : vector<2xf32>
    %28 = vector.multi_reduction <maximumf>, %27, %cst_16 [1] : vector<2x16xf32> to vector<2xf32>
    %29 = vector.shape_cast %28 : vector<2xf32> to vector<2x1xf32>
    %30 = vector.broadcast %29 : vector<2x1xf32> to vector<2x16xf32>
    %31 = arith.subf %27, %30 : vector<2x16xf32>
    %32 = math.exp %31 : vector<2x16xf32>
    %cst_17 = arith.constant dense<0.000000e+00> : vector<2xf32>
    %33 = vector.multi_reduction <add>, %32, %cst_17 [1] : vector<2x16xf32> to vector<2xf32>
    %34 = vector.shape_cast %33 : vector<2xf32> to vector<2x1xf32>
    %35 = math.log %34 : vector<2x1xf32>
    %36 = vector.broadcast %35 : vector<2x1xf32> to vector<2x16xf32>
    %37 = arith.subf %31, %36 : vector<2x16xf32>
    %c0_18 = arith.constant 0 : index
    %c0_19 = arith.constant 0 : index
    %38 = vector.load %arg6[%c0_18, %c0_19] : memref<2x16xf32, #tpu.memory_space<vmem>>, vector<2x16xf32>
    tpu.vector_store %arg6[%c0_18, %c0_19], %37 {strides = array<i32>} : memref<2x16xf32, #tpu.memory_space<vmem>>, vector<2x16xf32>,
    %cst_20 = arith.constant -1.000000e+10 : f32
    %39 = vector.broadcast %cst_20 : f32 to vector<2x16xf32>
    %40 = arith.select %25, %39, %22 : vector<2x16xi1>, vector<2x16xf32>
    %cst_21 = arith.constant dense<0xFF800000> : vector<2xf32>
    %41 = vector.multi_reduction <maximumf>, %40, %cst_21 [1] : vector<2x16xf32> to vector<2xf32>
    %42 = vector.shape_cast %41 : vector<2xf32> to vector<2x1xf32>
    %43 = vector.broadcast %42 : vector<2x1xf32> to vector<2x16xf32>
    %44 = arith.subf %40, %43 : vector<2x16xf32>
    %45 = math.exp %44 : vector<2x16xf32>
    %cst_22 = arith.constant dense<0.000000e+00> : vector<2xf32>
    %46 = vector.multi_reduction <add>, %45, %cst_22 [1] : vector<2x16xf32> to vector<2xf32>
    %47 = vector.shape_cast %46 : vector<2xf32> to vector<2x1xf32>
    %48 = math.log %47 : vector<2x1xf32>
    %49 = vector.broadcast %48 : vector<2x1xf32> to vector<2x16xf32>
    %50 = arith.subf %44, %49 : vector<2x16xf32>
    %c0_23 = arith.constant 0 : index
    %c0_24 = arith.constant 0 : index
    %51 = vector.load %arg7[%c0_23, %c0_24] : memref<2x16xf32, #tpu.memory_space<vmem>>, vector<2x16xf32>
    tpu.vector_store %arg7[%c0_23, %c0_24], %50 {strides = array<i32>} : memref<2x16xf32, #tpu.memory_space<vmem>>, vector<2x16xf32>,
    return
  }
  func.func @transform_0(%arg0: i32) -> (i32, i32, i32) {
    %c0_i32 = arith.constant 0 : i32
    %c0_i32_0 = arith.constant 0 : i32
    %c0_i32_1 = arith.constant 0 : i32
    return %arg0, %c0_i32, %c0_i32_0 : i32, i32, i32
  }
  func.func @transform_1(%arg0: i32) -> (i32, i32, i32) {
    %c0_i32 = arith.constant 0 : i32
    %c0_i32_0 = arith.constant 0 : i32
    %c0_i32_1 = arith.constant 0 : i32
    return %arg0, %c0_i32, %c0_i32_0 : i32, i32, i32
  }
  func.func @transform_2(%arg0: i32) -> (i32, i32, i32) {
    %c0_i32 = arith.constant 0 : i32
    %c0_i32_0 = arith.constant 0 : i32
    %c0_i32_1 = arith.constant 0 : i32
    return %arg0, %c0_i32, %c0_i32_0 : i32, i32, i32
  }
  func.func @transform_3(%arg0: i32) -> (i32, i32) {
    %c0_i32 = arith.constant 0 : i32
    %c0_i32_0 = arith.constant 0 : i32
    return %arg0, %c0_i32 : i32, i32
  }
  func.func @transform_4(%arg0: i32) -> (i32, i32, i32) {
    %c0_i32 = arith.constant 0 : i32
    %c0_i32_0 = arith.constant 0 : i32
    %c0_i32_1 = arith.constant 0 : i32
    %c0_i32_2 = arith.constant 0 : i32
    return %c0_i32, %c0_i32_0, %c0_i32_1 : i32, i32, i32
  }
  func.func @transform_5(%arg0: i32) -> (i32, i32) {
    %c0_i32 = arith.constant 0 : i32
    %c0_i32_0 = arith.constant 0 : i32
    return %arg0, %c0_i32 : i32, i32
  }
  func.func @transform_6(%arg0: i32) -> (i32, i32) {
    %c0_i32 = arith.constant 0 : i32
    %c0_i32_0 = arith.constant 0 : i32
    return %arg0, %c0_i32 : i32, i32
  }
}

</mosaic_0001>

<bundles_post_ra>
// kernel: tpu_custom_call.1
= control target key start
LH: loop header
LB: loop body
LE: loop exit
PB: predicated region body
PF: predicated region fallthrough
CT: control target
= control target key end

     0   :  { %6 = vsyncpa [#allocation3], 0  ;;  %s170_s0 = inlined_call_operand.hbm [shape: f32[2,4,8], index: 0, kind: input, shape index: {}]   ;;  %s171_s1 = inlined_call_operand.hbm [shape: f32[2,16], index: 1, kind: output, shape index: {}]  }
   0x1   :  { %7 = vsyncpa [#allocation4], 0  ;;  %s146_s6 = smov [#allocation2]  }
   0x2   :  { %s13_s7 = sshll.u32 %s146_s6, 4  ;;  %s14_s7 = int_to_ptr.vmem [resolvable:$true] %s13_s7 }
   0x3   :  { %s110_s8 = scalar_lea.vmem %s14_s7, 128  ;;  %p115_p1 = scmp.lt.s32.totalorder %s14_s7, %s14_s7 }
   0x4   :  { %p111_p0 = scmp.ne.s32.totalorder %s14_s7, %s110_s8  ;;  %p116_p2 = scmp.lt.s32.totalorder %s110_s8, %s110_s8 }
   0x6   :  { %p117_p3 = por %p116_p2, %p115_p1 }
   0x8   :  { %p118_p4 = pnand %p117_p3, %p111_p0 }
   0xa   :  { %121 = shalt.err (!%p118_p4)
}
   0xb   :  { %s147_s9 = smov 64   ;;  %s148_s10 = smov 4  }
   0xc   :  { %19 = dma.hbm_to_vmem [thread:$0]  %s170_s0, 128, %s14_s7, [#allocation3], %s147_s9, %s147_s9, %s148_s10  }
   0xd   :  { %142 = dma.done.wait [#allocation3], 128  }
   0xe   :  { %143 = vsyncadd [#allocation3], 4294967168  ;;  %v44_v0 = vlaneseq  ;;  %v149_v1 = vmov 1934713408   ;;  %v150_v12 = vmov 0.0   ;;  %s151_s13 = smov 12  }
   0xf   :  { %v42_v2 = vunpack.c.l.s4 %v149_v1  ;;  %v92_v5 = vld.sshfl [vmem:[#allocation2] sm:$0x33 pattern:$0x76325410]  ;;  %s152_s0 = smov 8   ;;  %vm69_vm0 = vcmask 31744  }
  0x10   :  { %v45_v4 = vshrl.u32 %v44_v0, 7  ;;  %v93_v7 = vld.sshfl [vmem:[#allocation2 + $0x4] sm:$0x33 pattern:$0x76325410]  ;;  %vm71_vm1 = vcmask 64512  }
  0x11   :  { %v43_v3 = vunpack.c.0.s8 %v42_v2  ;;  %v39_v8 = vcombine.low %v92_v5, %v93_v7  ;;  %v40_v9 = vcombine.high %v92_v5, %v93_v7  ;;  %s153_s14 = smov [#allocation5]   ;;  %vm73_vm2 = vcmask 97280  }
  0x12   :  { %s83_s15 = sshll.u32 %s153_s14, 4  ;;  %vm75_vm3 = vcmask 123904   ;;  %s84_s15 = int_to_ptr.vmem [resolvable:$true] %s83_s15 }
  0x13   :  { %v46_v6 = vsub.s32 %v43_v3, %v45_v4  ;;  %s122_s16 = scalar_lea.vmem %s84_s15, 32  ;;  %p127_p6 = scmp.lt.s32.totalorder %s84_s15, %s84_s15 }
  0x14   :  { %p123_p5 = scmp.ne.s32.totalorder %s84_s15, %s122_s16  ;;  %p128_p7 = scmp.lt.s32.totalorder %s122_s16, %s122_s16 }
  0x15   :  { %v47_v10 = vrot.slane %v39_v8, %v46_v6  ;;  %v54_v11 = vrot.slane %v40_v9, %v46_v6 }
  0x16   :  { %p129_p8 = por %p128_p7, %p127_p6 }
  0x17   :  { %v55_v13 = vcombine.high %v47_v10, %v150_v12  ;;  %v56_v14 = vcombine.high %v54_v11, %v150_v12 }
  0x18   :  { %p130_p9 = pnand %p129_p8, %p123_p5 }
  0x19   :  { %58 = vrot.lane.b32.xlu0 %v55_v13, %s148_s10  ;;  %66 = vrot.lane.b32.xlu1 %v56_v14, %s151_s13 }
  0x1d   :  { %62 = vrot.lane.b32.xlu0 %v54_v11, %s152_s0 }
  0x8b   :  { %v59_v15 = vpop.permute.xlu0 %58  ;;  %v67_v16 = vpop.permute.xlu1 %66 }
  0x8c   :  { %v70_v17 = vsel %vm69_vm0, %v47_v10, %v59_v15 }
  0x8f   :  { %v63_v18 = vpop.permute.xlu0 %62 }
  0x90   :  { %v72_v19 = vsel %vm71_vm1, %v70_v17, %v63_v18 }
  0x91   :  { %v74_v20 = vsel %vm73_vm2, %v72_v19, %v67_v16 }
  0x92   :  { %76 = vst.msk [vmem:[#allocation5] sm:$0x3] %vm75_vm3, %v74_v20 }
  0x93   :  { %133 = shalt.err (!%p130_p9)
}
  0x94   :  { %86 = dma.vmem_to_hbm [thread:$0]  %s84_s15, 32, %s171_s1, [#allocation4]  }
  0x95   :  { %144 = dma.done.wait [#allocation4], 32  }
  0x96   :  { %145 = vsyncadd [#allocation4], 4294967264 }
  0x97   :  { %90 = vsyncpa [#allocation3], 1 }
  0x98   :  { %91 = vsyncpa [#allocation4], 1 }

// kernel: _out_forward_impl.1
= control target key start
LH: loop header
LB: loop body
LE: loop exit
PB: predicated region body
PF: predicated region fallthrough
CT: control target
= control target key end

     0   :  { %12 = vsyncpa [#allocation3], 0  ;;  %vm48_vm0 = vcmask 261120   ;;  %s770_s0 = inlined_call_operand.vmem [shape: f32[2,16,32], index: 0, kind: input, shape index: {}]   ;;  %s771_s1 = inlined_call_operand.vmem [shape: f32[2,16,32], index: 1, kind: input, shape index: {}]   ;;  %s772_s2 = inlined_call_operand.vmem [shape: f32[2,16,32], index: 2, kind: input, shape index: {}]   ;;  %s773_s3 = inlined_call_operand.vmem [shape: s32[2,16], index: 3, kind: input, shape index: {}]   ;;  %s774_s4 = inlined_call_operand.vmem [shape: f32[3,32,2], index: 4, kind: input, shape index: {}]   ;;  %s775_s5 = inlined_call_operand.hbm [shape: f32[2,16], index: 5, kind: output, shape index: {0}]   ;;  %s776_s6 = inlined_call_operand.hbm [shape: f32[2,16], index: 6, kind: output, shape index: {1}]  }
   0x1   :  { %v43_v0 = vld [vmem:[%s774_s4 + $0x38] sm:$0xff]  ;;  %v42_v2 = vld [vmem:[%s774_s4 + $0x30] sm:$0xff]  ;;  %v41_v4 = vld [vmem:[%s774_s4 + $0x28] sm:$0xff] }
   0x2   :  { %v39_v1 = vld [vmem:[%s774_s4 + $0x18] sm:$0xff]  ;;  %512 = vmatprep.subr.mxu0 %v43_v0  ;;  %v38_v3 = vld [vmem:[%s774_s4 + $0x10] sm:$0xff]  ;;  %v37_v5 = vld [vmem:[%s774_s4 + $0x8] sm:$0xff] }
   0x3   :  { %526 = vmatprep.subr.mxu1 %v39_v1  ;;  %513 = vmatpush3.msra.mxu0 %v43_v0  ;;  %v40_v6 = vld [vmem:[%s774_s4 + $0x20] sm:$0xff]  ;;  %v29_v10 = vld [vmem:[%s771_s1 + $0x8] sm:$0xff]  ;;  %v47_v12 = vld [vmem:[%s774_s4 + $0x58] sm:$0xff] }
   0x4   :  { %527 = vmatpush3.msra.mxu1 %v39_v1  ;;  %514 = vmatprep.subr.mxu0 %v42_v2  ;;  %v36_v7 = vld [vmem:[%s774_s4] sm:$0xff]  ;;  %v25_v11 = vld [vmem:[%s770_s0 + $0x8] sm:$0xff] }
   0x5   :  { %528 = vmatprep.subr.mxu1 %v38_v3  ;;  %515 = vmatpush3.msra.mxu0 %v42_v2  ;;  %v28_v8 = vld [vmem:[%s771_s1] sm:$0xff] }
   0x6   :  { %529 = vmatpush3.msra.mxu1 %v38_v3  ;;  %516 = vmatprep.subr.mxu0 %v41_v4  ;;  %v24_v9 = vld [vmem:[%s770_s0] sm:$0xff] }
   0x7   :  { %530 = vmatprep.subr.mxu1 %v37_v5  ;;  %517 = vmatpush3.msra.mxu0 %v41_v4 }
   0x8   :  { %531 = vmatpush3.msra.mxu1 %v37_v5  ;;  %518 = vmatprep.subr.mxu0 %v40_v6 }
   0x9   :  { %532 = vmatprep.subr.mxu1 %v36_v7  ;;  %519 = vmatpush3.msra.mxu0 %v40_v6 }
   0xa   :  { %520 = vmatprep.mubr.msk.f32.mxu0 %vm48_vm0, %v28_v8 }
   0xb   :  { %13 = vsyncpa [#allocation5], 0  ;;  %533 = vmatpush3.msra.mxu1 %v36_v7  ;;  %534 = vmatprep.mubr.msk.f32.mxu1 %vm48_vm0, %v24_v9  ;;  %v46_v13 = vld [vmem:[%s774_s4 + $0x50] sm:$0xff]  ;;  %v31_v16 = vld [vmem:[%s771_s1 + $0x18] sm:$0xff]  ;;  %v624_v24 = vmov 0   ;;  %v625_v42 = vmov 1   ;;  %v362_v46 = vlaneseq }
   0xc   :  { %521 = vmatmul.mubr.msk.f32.vlgmr.msra.gmra.mxu0 %vm48_vm0, %v29_v10  ;;  %535 = vmatmul.mubr.msk.f32.vlgmr.msra.gmra.mxu1 %vm48_vm0, %v25_v11  ;;  %v30_v14 = vld [vmem:[%s771_s1 + $0x10] sm:$0xff]  ;;  %v27_v17 = vld [vmem:[%s770_s0 + $0x18] sm:$0xff]  ;;  %v45_v18 = vld [vmem:[%s774_s4 + $0x48] sm:$0xff]  ;;  %vm373_vm1 = vcmask 130112   ;;  %vm384_vm2 = vcmask 1041409   ;;  %vm388_vm4 = vcmask 123904  }
   0xd   :  { %540 = vmatprep.subr.mxu0 %v47_v12  ;;  %554 = vmatprep.subr.mxu1 %v47_v12  ;;  %v26_v15 = vld [vmem:[%s770_s0 + $0x10] sm:$0xff]  ;;  %v44_v19 = vld [vmem:[%s774_s4 + $0x40] sm:$0xff]  ;;  %v33_v22 = vld [vmem:[%s772_s2 + $0x8] sm:$0xff]  ;;  %v363_v47 = vand.u32 127, %v362_v46  ;;  %v365_v50 = vshrl.u32 %v362_v46, 7  ;;  %s627_s20 = smov [#allocation4]  }
   0xe   :  { %541 = vmatpush3.msra.mxu0 %v47_v12  ;;  %558 = vmatpush3.msra.mxu1 %v47_v12  ;;  %v32_v20 = vld [vmem:[%s772_s2] sm:$0xff]  ;;  %v34_v21 = vld [vmem:[%s772_s2 + $0x10] sm:$0xff]  ;;  %v35_v23 = vld [vmem:[%s772_s2 + $0x18] sm:$0xff]  ;;  %s464_s21 = sshll.u32 %s627_s20, 4  ;;  %s465_s21 = int_to_ptr.vmem [resolvable:$true] %s464_s21 }
   0xf   :  { %542 = vmatprep.subr.mxu0 %v46_v13  ;;  %555 = vmatprep.subr.mxu1 %v46_v13  ;;  %v368_v51 = vadd.s32 4294967288, %v363_v47  ;;  %v366_v53 = vsub.s32 %v363_v47, %v365_v50  ;;  %v344_v58 = vld [vmem:[%s773_s3] sm:$0x3]  ;;  %s626_s3 = smov [#allocation2]  }
  0x10   :  { %523 = vmatprep.mubr.msk.f32.mxu0 %vm48_vm0, %v30_v14  ;;  %537 = vmatprep.mubr.msk.f32.mxu1 %vm48_vm0, %v26_v15  ;;  %vm345_vm3 = vcmp.ne.s32.totalorder %v344_v58, 0  ;;  %s454_s19 = sshll.u32 %s626_s3, 4  ;;  %s455_s19 = int_to_ptr.vmem [resolvable:$true] %s454_s19 }
  0x11   :  { %543 = vmatpush3.msra.mxu0 %v46_v13  ;;  %559 = vmatpush3.msra.mxu1 %v46_v13  ;;  %v371_v55 = vsub.s32 %v368_v51, %v365_v50  ;;  %s580_s22 = scalar_lea.vmem %s455_s19, 32  ;;  %p585_p1 = scmp.lt.s32.totalorder %s455_s19, %s455_s19 }
  0x12   :  { %524 = vmatmul.mubr.msk.f32.gmra.mxu0 %vm48_vm0, %v31_v16  ;;  %538 = vmatmul.mubr.msk.f32.gmra.mxu1 %vm48_vm0, %v27_v17  ;;  %p581_p0 = scmp.ne.s32.totalorder %s455_s19, %s580_s22  ;;  %p586_p2 = scmp.lt.s32.totalorder %s580_s22, %s580_s22 }
  0x13   :  { %544 = vmatprep.subr.mxu0 %v45_v18  ;;  %556 = vmatprep.subr.mxu1 %v45_v18 }
  0x14   :  { %545 = vmatpush3.msra.mxu0 %v45_v18  ;;  %560 = vmatpush3.msra.mxu1 %v45_v18  ;;  %p587_p3 = por %p586_p2, %p585_p1 }
  0x15   :  { %546 = vmatprep.subr.mxu0 %v44_v19  ;;  %557 = vmatprep.subr.mxu1 %v44_v19 }
  0x16   :  { %547 = vmatpush3.msra.mxu0 %v44_v19  ;;  %561 = vmatpush3.msra.mxu1 %v44_v19  ;;  %p588_p4 = pnand %p587_p3, %p581_p0 }
  0x17   :  { %548 = vmatprep.mubr.msk.f32.mxu0 %vm48_vm0, %v32_v20  ;;  %551 = vmatprep.mubr.msk.f32.mxu1 %vm48_vm0, %v34_v21 }
  0x18   :  { %549 = vmatmul.mubr.msk.f32.vlgmr.msra.gmra.mxu0 %vm48_vm0, %v33_v22  ;;  %552 = vmatmul.mubr.msk.f32.vlgmr.msra.gmra.mxu1 %vm48_vm0, %v35_v23 }
  0x19   :  { %567 = vset.pattern.permute.xlu1 %v624_v24  ;;  %566 = vset.pattern.permute.xlu0 %v624_v24 }
  0xcc   :  { %v522_v25 = vpop.f32.mrf.mxu0  ;;  %v536_v26 = vpop.f32.mrf.mxu1 }
  0xcd   :  { %v230_v33 = vadd.f32 %v536_v26, %v522_v25 }
  0xce   :  { %v127_v27 = vpop.f32.mrf.mxu0  ;;  %v224_v28 = vpop.f32.mrf.mxu1 }
  0xcf   :  { %v225_v40 = vadd.f32 %v224_v28, %v127_v27 }
  0xd2   :  { %v525_v29 = vpop.f32.mrf.mxu0  ;;  %v539_v30 = vpop.f32.mrf.mxu1 }
  0xd3   :  { %v240_v34 = vadd.f32 %v539_v30, %v525_v29 }
  0xd4   :  { %v137_v31 = vpop.f32.mrf.mxu0  ;;  %v234_v32 = vpop.f32.mrf.mxu1 }
  0xd5   :  { %v235_v44 = vadd.f32 %v234_v32, %v137_v31 }
  0xd8   :  { %v550_v35 = vpop.f32.mrf.mxu0  ;;  %v553_v36 = vpop.f32.mrf.mxu1 }
  0xd9   :  { %v341_v37 = vadd.f32 %v550_v35, %v230_v33  ;;  %v343_v38 = vadd.f32 %v553_v36, %v240_v34 }
  0xda   :  { %v321_v39 = vpop.f32.mrf.mxu0  ;;  %v331_v43 = vpop.f32.mrf.mxu1 }
  0xdb   :  { %354 = vperm.xlu0 %566, %v341_v37   ;;  %360 = vperm.xlu1 %567, %v343_v38   ;;  %v340_v41 = vadd.f32 %v321_v39, %v225_v40  ;;  %v342_v45 = vadd.f32 %v331_v43, %v235_v44 }
  0xdf   :  { %568 = vset.pattern.permute.xlu1 %v625_v42  ;;  %351 = vperm.xlu0 %566, %v340_v41  }
  0xe0   :  { %406 = vperm.xlu1 %568, %v341_v37  }
  0xe3   :  { %570 = vset.pattern.permute.xlu0 %v625_v42 }
  0xe4   :  { %569 = vset.pattern.permute.xlu1 %v624_v24  ;;  %403 = vperm.xlu0 %570, %v340_v41  }
  0xe5   :  { %357 = vperm.xlu1 %569, %v342_v45  }
  0xe8   :  { %412 = vperm.xlu0 %570, %v343_v38  }
  0xe9   :  { %571 = vset.pattern.permute.xlu1 %v625_v42 }
  0xea   :  { %409 = vperm.xlu1 %571, %v342_v45  }
 0x156   :  { %v355_v48 = vpop.permute.xlu0 %354  ;;  %v361_v49 = vpop.permute.xlu1 %360 }
 0x157   :  { %v372_v60 = vrot.slane %v355_v48, %v371_v55  ;;  %v382_v61 = vrot.slane %v361_v49, %v371_v55 }
 0x15a   :  { %v352_v52 = vpop.permute.xlu0 %351 }
 0x15b   :  { %v407_v54 = vpop.permute.xlu1 %406  ;;  %v367_v56 = vrot.slane %v352_v52, %v366_v53 }
 0x15c   :  { %v421_v6 = vrot.slane %v407_v54, %v371_v55 }
 0x15d   :  { %v374_v0 = vsel %vm373_vm1, %v372_v60, %v367_v56 }
 0x15f   :  { %v404_v57 = vpop.permute.xlu0 %403 }
 0x160   :  { %v358_v59 = vpop.permute.xlu1 %357  ;;  %v417_v2 = vrot.slane %v404_v57, %v366_v53 }
 0x161   :  { %v378_v62 = vrot.slane %v358_v59, %v366_v53 }
 0x162   :  { %v422_v10 = vsel %vm373_vm1, %v421_v6, %v417_v2 }
 0x163   :  { %v413_v63 = vpop.permute.xlu0 %412  ;;  %v383_v1 = vsel %vm373_vm1, %v382_v61, %v378_v62 }
 0x164   :  { %v385_v3 = vsel %vm384_vm2, %v383_v1, %v374_v0  ;;  %v430_v7 = vrot.slane %v413_v63, %v371_v55 }
 0x165   :  { %v410_v4 = vpop.permute.xlu1 %409  ;;  %v387_v5 = vsel %vm345_vm3, -1e+10, %v385_v3 }
 0x166   :  { %v426_v8 = vrot.slane %v410_v4, %v366_v53  ;;  %v389_v9 = vsel %vm388_vm4, %v387_v5, -inf }
 0x167   :  { %390 = vmax.xlane.f32.xlu1 %v389_v9 }
 0x168   :  { %v431_v11 = vsel %vm373_vm1, %v430_v7, %v426_v8 }
 0x169   :  { %v432_v12 = vsel %vm384_vm2, %v431_v11, %v422_v10 }
 0x16a   :  { %v434_v13 = vsel %vm345_vm3, -1e+10, %v432_v12 }
 0x16b   :  { %v435_v14 = vsel %vm388_vm4, %v434_v13, -inf }
 0x16c   :  { %436 = vmax.xlane.f32.xlu0 %v435_v14 }
 0x1f0   :  { %v391_v15 = vpop.xlane.xlu1 %390 }
 0x1f1   :  { %v392_v16 = vsub.f32 %v387_v5, %v391_v15 }
 0x1f3   :  { %v393_v17 = vmul.f32 1.442695, %v392_v16 }
 0x1f5   :  { %572 = vpow2.f32 %v393_v17  ;;  %v437_v18 = vpop.xlane.xlu0 %436 }
 0x1f6   :  { %v438_v19 = vsub.f32 %v434_v13, %v437_v18 }
 0x1f8   :  { %v439_v20 = vmul.f32 1.442695, %v438_v19 }
 0x1fa   :  { %574 = vpow2.f32 %v439_v20 }
 0x202   :  { %v573_v21 = vpop.eup %572 }
 0x203   :  { %v395_v22 = vsel %vm388_vm4, %v573_v21, 0.0 }
 0x204   :  { %396 = vadd.xlane.f32.xlu0 %v395_v22 }
 0x207   :  { %v575_v23 = vpop.eup %574 }
 0x208   :  { %v441_v24 = vsel %vm388_vm4, %v575_v23, 0.0 }
 0x209   :  { %442 = vadd.xlane.f32.xlu1 %v441_v24 }
 0x28d   :  { %v397_v25 = vpop.xlane.xlu0 %396 }
 0x28e   :  { %576 = vlog2.f32 %v397_v25 }
 0x292   :  { %v443_v26 = vpop.xlane.xlu1 %442 }
 0x293   :  { %578 = vlog2.f32 %v443_v26 }
 0x29b   :  { %v577_v27 = vpop.eup %576 }
 0x29c   :  { %v399_v28 = vmul.f32 0.6931472, %v577_v27 }
 0x29e   :  { %v400_v29 = vsub.f32 %v392_v16, %v399_v28 }
 0x2a0   :  { %v579_v30 = vpop.eup %578  ;;  %401 = vst.msk [vmem:[#allocation2] sm:$0x3] %vm388_vm4, %v400_v29 }
 0x2a1   :  { %v445_v31 = vmul.f32 0.6931472, %v579_v30 }
 0x2a2   :  { %591 = shalt.err (!%p588_p4)
}
 0x2a3   :  { %457 = dma.vmem_to_hbm [thread:$0]  %s455_s19, 32, %s775_s5, [#allocation3]   ;;  %v446_v32 = vsub.f32 %v438_v19, %v445_v31 }
 0x2a4   :  { %s600_s25 = scalar_lea.vmem %s465_s21, 32  ;;  %p605_p6 = scmp.lt.s32.totalorder %s465_s21, %s465_s21 }
 0x2a5   :  { %447 = vst.msk [vmem:[#allocation4] sm:$0x3] %vm388_vm4, %v446_v32  ;;  %p601_p5 = scmp.ne.s32.totalorder %s465_s21, %s600_s25  ;;  %p606_p7 = scmp.lt.s32.totalorder %s600_s25, %s600_s25 }
 0x2a7   :  { %p607_p8 = por %p606_p7, %p605_p6 }
 0x2a9   :  { %p608_p9 = pnand %p607_p8, %p601_p5 }
 0x2ab   :  { %611 = shalt.err (!%p608_p9)
}
 0x2ac   :  { %467 = dma.vmem_to_hbm [thread:$0]  %s465_s21, 32, %s776_s6, [#allocation5]  }
 0x2ad   :  { %620 = dma.done.wait [#allocation3], 32  }
 0x2ae   :  { %621 = vsyncadd [#allocation3], 4294967264 }
 0x2af   :  { %622 = dma.done.wait [#allocation5], 32  }
 0x2b0   :  { %623 = vsyncadd [#allocation5], 4294967264 }
 0x2b1   :  { %474 = vsyncpa [#allocation3], 1 }
 0x2b2   :  { %475 = vsyncpa [#allocation5], 1 }

</bundles_post_ra>
